<compile_context>
chip_gen: v7x
topology: tpu7x:2x2x1
jax: 0.10.0
libtpu: 0.0.40
codegen_flags: <defaults>
</compile_context>

<pallas_src>
import functools

import jax
import jax.numpy as jnp
import numpy as np
from jax.experimental import pallas as pl
from jax.experimental.pallas import tpu as pltpu


def _contrastive_loss_kernel(img_ref, txt_ref, out_ref, *,
                             margin: float, batch: int, tile_b: int,
                             steps: int, need_mask: bool):
    c = pl.program_id(0)          # core-shard index (parallel axis)
    i = pl.program_id(1)          # streaming reduction step (arbitrary axis)

    # ---- init the resident per-shard accumulator (the output block itself) ----
    @pl.when(i == 0)
    def _():
        out_ref[...] = jnp.zeros_like(out_ref)

    # ---- per-tile row-wise reduction (D kept whole on the lane axis) ----
    img = img_ref[...].astype(jnp.float32)           # (tile_b, D)
    txt = txt_ref[...].astype(jnp.float32)

    eps = jnp.float32(1e-6)                          # F.pairwise_distance eps on diff
    diff = img - txt + eps
    d2 = jnp.sum(diff * diff, axis=-1, keepdims=True)    # (tile_b, 1)
    d = jnp.sqrt(d2)
    hinge = jnp.maximum(jnp.float32(margin) - d, 0.0)
    # fused per-row contribution: d^2 + (B-1) * relu(margin - d)^2
    contrib = d2 + jnp.float32(batch - 1) * (hinge * hinge)

    if need_mask:
        # mask rows that fall past the true batch (ragged last tile only)
        block_idx = c * steps + i
        row = block_idx * tile_b + jax.lax.broadcasted_iota(jnp.int32, (tile_b, 1), 0)
        contrib = jnp.where(row < batch, contrib, 0.0)

    out_ref[...] = out_ref[...] + jnp.sum(contrib)

    # ---- finalize: scale the per-shard partial on the last streaming step ----
    @pl.when(i == pl.num_programs(1) - 1)
    def _():
        out_ref[...] = out_ref[...] * jnp.float32(1.0 / (2.0 * batch * batch))


def _tpu_kind() -> str:
    try:
        return jax.devices()[0].device_kind.lower()
    except Exception:
        return ""


def _gen_config(kind: str):
    """Generation-aware sizing: per-input-per-buffer byte budget, row cap,
    scoped VMEM limit to request, and core shards for the parallel grid axis."""
    if "v7" in kind or "7x" in kind:
        # 64 MiB physical VMEM per TC, but 2 TCs per chip -> shard the batch.
        return dict(budget=4 << 20, rows_cap=1024, vmem_limit=48 << 20, shards=2)
    if "v6" in kind:
        # 128 MiB VMEM, single TC: bigger blocks amortize per-grid-step overhead.
        return dict(budget=8 << 20, rows_cap=2048, vmem_limit=96 << 20, shards=1)
    if "v5" in kind:
        # 128 MiB physical but only 16 MiB scoped by default: raise the limit
        # and keep 2 inputs x 2 pipeline buffers x budget well under it.
        return dict(budget=3 << 20, rows_cap=1024, vmem_limit=64 << 20, shards=1)
    if "v2" in kind or "v3" in kind:
        return dict(budget=2 << 20, rows_cap=512, vmem_limit=None, shards=1)
    return dict(budget=4 << 20, rows_cap=1024, vmem_limit=64 << 20, shards=1)


def _choose_tile_b(batch: int, feat_dim: int, itemsize: int,
                   budget_bytes: int, rows_cap: int) -> int:
    rows = budget_bytes // max(feat_dim * itemsize, 1)
    rows = int(max(16, min(rows, rows_cap)))
    rows -= rows % 16                                # keep bf16 (16,128) sublane packing
    if batch <= rows:
        return batch                                 # full-dim block (always legal)
    return rows


def contrastive_loss(image_features, text_features, margin: float = 1.0,
                     tile_b: int | None = None,
                     num_core_shards: int | None = None):
    """Pallas-TPU forward of ContrastiveLoss. Returns a scalar f32."""
    assert image_features.shape == text_features.shape
    B, D = image_features.shape
    itemsize = image_features.dtype.itemsize

    cfg = _gen_config(_tpu_kind())
    if tile_b is None:
        tile_b = _choose_tile_b(B, D, itemsize, cfg["budget"], cfg["rows_cap"])
    if num_core_shards is None:
        num_core_shards = cfg["shards"]

    total_blocks = pl.cdiv(B, tile_b)
    num_shards = max(1, min(int(num_core_shards), total_blocks))
    # Shard across TensorCores only when the blocks divide evenly; otherwise
    # fall back to one shard (keeps every block index strictly in bounds).
    if total_blocks % num_shards != 0:
        num_shards = 1
    steps = total_blocks // num_shards
    need_mask = (B % tile_b) != 0          # skip masking entirely for full tiles

    def in_index_map(c, i):
        return (c * steps + i, 0)

    kernel = functools.partial(_contrastive_loss_kernel,
                               margin=float(margin), batch=B, tile_b=tile_b,
                               steps=steps, need_mask=need_mask)

    in_spec = pl.BlockSpec((tile_b, D), in_index_map)
    out = pl.pallas_call(
        kernel,
        out_shape=jax.ShapeDtypeStruct((num_shards, 1, 1), jnp.float32),
        grid=(num_shards, steps),
        in_specs=[in_spec, in_spec],
        out_specs=pl.BlockSpec((1, 1, 1), lambda c, i: (c, 0, 0)),
        compiler_params=pltpu.CompilerParams(
            dimension_semantics=("parallel", "arbitrary"),
            vmem_limit_bytes=cfg["vmem_limit"]),
        cost_estimate=pl.CostEstimate(
            flops=4 * B * D,
            transcendentals=B,
            bytes_accessed=2 * B * D * itemsize + 4),
    )(image_features, text_features)
    return jnp.sum(out)


def _reference(image_features, text_features, margin: float = 1.0):
    """Pure-JAX reference mirroring the PyTorch forward (f32 math)."""
    img = image_features.astype(jnp.float32)
    txt = text_features.astype(jnp.float32)
    b = img.shape[0]
    label = 1.0 - jnp.eye(b, dtype=jnp.float32)
    d = jnp.linalg.norm(img - txt + 1e-6, axis=-1)   # (B,)
    loss = 0.5 * ((1.0 - label) * d**2 + label * jnp.maximum(margin - d, 0.0) ** 2)
    return jnp.mean(loss)


if __name__ == "__main__":
    # Case 1: small paired features, single tile, auto-sized.
    k_img, k_txt = jax.random.split(jax.random.PRNGKey(0))
    B, D = 8, 32
    image_features = jax.random.normal(k_img, (B, D), dtype=jnp.float32)
    text_features = jax.random.normal(k_txt, (B, D), dtype=jnp.float32)
    loss = jax.block_until_ready(contrastive_loss(image_features, text_features, margin=1.0))
    ref = _reference(image_features, text_features, margin=1.0)
    np.testing.assert_allclose(np.asarray(loss), np.asarray(ref), rtol=1e-5, atol=1e-6)

    # Case 2: forced small tile with a ragged last block (exercises the
    # streaming grid, resident accumulator and row-masking paths).
    k2_img, k2_txt = jax.random.split(jax.random.PRNGKey(1))
    B2, D2 = 20, 32
    img2 = jax.random.normal(k2_img, (B2, D2), dtype=jnp.float32)
    txt2 = jax.random.normal(k2_txt, (B2, D2), dtype=jnp.float32)
    loss2 = jax.block_until_ready(contrastive_loss(img2, txt2, margin=0.75, tile_b=8))
    ref2 = _reference(img2, txt2, margin=0.75)
    np.testing.assert_allclose(np.asarray(loss2), np.asarray(ref2), rtol=1e-5, atol=1e-6)

    # Case 3: bf16 inputs with an explicit 2-way core-shard grid (the v7x
    # dual-TensorCore path; on single-TC chips the parallel axis runs
    # sequentially and stays correct).
    k3_img, k3_txt = jax.random.split(jax.random.PRNGKey(2))
    B3, D3 = 32, 128
    img3 = jax.random.normal(k3_img, (B3, D3), dtype=jnp.bfloat16)
    txt3 = jax.random.normal(k3_txt, (B3, D3), dtype=jnp.bfloat16)
    loss3 = jax.block_until_ready(
        contrastive_loss(img3, txt3, margin=1.0, tile_b=16, num_core_shards=2))
    ref3 = _reference(img3, txt3, margin=1.0)
    np.testing.assert_allclose(np.asarray(loss3), np.asarray(ref3), rtol=1e-4, atol=1e-5)

    print("KERNEL_OK")
</pallas_src>

<mosaic_0001>
module attributes {stable_mosaic.version = 11 : i64} {
  func.func @_contrastive_loss_kernel(%arg0: i32, %arg1: i32, %arg2: memref<8x32xf32, #tpu.memory_space<vmem>>, %arg3: memref<8x32xf32, #tpu.memory_space<vmem>>, %arg4: memref<1x1x1xf32, #tpu.memory_space<vmem>>) attributes {dimension_semantics = [#tpu.dimension_semantics<parallel>, #tpu.dimension_semantics<arbitrary>], iteration_bounds = array<i64: 1, 1>, scalar_prefetch = 0 : i64, scratch_operands = 0 : i64, tpu.core_type = #tpu.core_type<tc>, window_params = [{transform_indices = @transform_0, window_bounds = array<i64: 8, 32>}, {transform_indices = @transform_1, window_bounds = array<i64: 8, 32>}, {transform_indices = @transform_2, window_bounds = array<i64: 1, 1, 1>}]} {
    %c0_i32 = arith.constant 0 : i32
    %0 = arith.cmpi eq, %arg1, %c0_i32 : i32
    %1 = arith.extui %0 : i1 to i32
    %c0_i32_0 = arith.constant 0 : i32
    %2 = arith.cmpi ne, %1, %c0_i32_0 : i32
    scf.if %2 {
      %cst_17 = arith.constant 0.000000e+00 : f32
      %31 = vector.broadcast %cst_17 : f32 to vector<1x1x1xf32>
      %c0_18 = arith.constant 0 : index
      %c0_19 = arith.constant 0 : index
      %c0_20 = arith.constant 0 : index
      %32 = vector.load %arg4[%c0_18, %c0_19, %c0_20] : memref<1x1x1xf32, #tpu.memory_space<vmem>>, vector<1x1x1xf32>
      tpu.vector_store %arg4[%c0_18, %c0_19, %c0_20], %31 {strides = array<i32>} : memref<1x1x1xf32, #tpu.memory_space<vmem>>, vector<1x1x1xf32>,
    } else {
    }
    %c0 = arith.constant 0 : index
    %c0_1 = arith.constant 0 : index
    %3 = vector.load %arg2[%c0, %c0_1] : memref<8x32xf32, #tpu.memory_space<vmem>>, vector<8x32xf32>
    %c0_2 = arith.constant 0 : index
    %c0_3 = arith.constant 0 : index
    %4 = vector.load %arg3[%c0_2, %c0_3] : memref<8x32xf32, #tpu.memory_space<vmem>>, vector<8x32xf32>
    %5 = arith.subf %3, %4 : vector<8x32xf32>
    %cst = arith.constant 9.99999997E-7 : f32
    %6 = vector.broadcast %cst : f32 to vector<8x32xf32>
    %7 = arith.addf %5, %6 : vector<8x32xf32>
    %8 = arith.mulf %7, %7 : vector<8x32xf32>
    %cst_4 = arith.constant dense<0.000000e+00> : vector<8xf32>
    %9 = vector.multi_reduction <add>, %8, %cst_4 [1] : vector<8x32xf32> to vector<8xf32>
    %10 = vector.shape_cast %9 : vector<8xf32> to vector<8x1xf32>
    %11 = math.sqrt %10 : vector<8x1xf32>
    %cst_5 = arith.constant 1.000000e+00 : f32
    %12 = vector.broadcast %cst_5 : f32 to vector<8x1xf32>
    %13 = arith.subf %12, %11 : vector<8x1xf32>
    %cst_6 = arith.constant 0.000000e+00 : f32
    %14 = vector.broadcast %cst_6 : f32 to vector<8x1xf32>
    %15 = arith.maximumf %13, %14 : vector<8x1xf32>
    %16 = arith.mulf %15, %15 : vector<8x1xf32>
    %cst_7 = arith.constant 7.000000e+00 : f32
    %17 = vector.broadcast %cst_7 : f32 to vector<8x1xf32>
    %18 = arith.mulf %17, %16 : vector<8x1xf32>
    %19 = arith.addf %10, %18 : vector<8x1xf32>
    %c0_8 = arith.constant 0 : index
    %c0_9 = arith.constant 0 : index
    %c0_10 = arith.constant 0 : index
    %20 = vector.load %arg4[%c0_8, %c0_9, %c0_10] : memref<1x1x1xf32, #tpu.memory_space<vmem>>, vector<1x1x1xf32>
    %21 = vector.shape_cast %19 : vector<8x1xf32> to vector<1x8x1xf32>
    %cst_11 = arith.constant dense<0.000000e+00> : vector<1xf32>
    %22 = vector.multi_reduction <add>, %21, %cst_11 [1, 2] : vector<1x8x1xf32> to vector<1xf32>
    %23 = vector.shape_cast %22 : vector<1xf32> to vector<1x1x1xf32>
    %24 = vector.extract %23[0, 0, 0] : f32 from vector<1x1x1xf32>
    %25 = vector.broadcast %24 : f32 to vector<1x1x1xf32>
    %26 = arith.addf %20, %25 : vector<1x1x1xf32>
    %c0_12 = arith.constant 0 : index
    %c0_13 = arith.constant 0 : index
    %c0_14 = arith.constant 0 : index
    %27 = vector.load %arg4[%c0_12, %c0_13, %c0_14] : memref<1x1x1xf32, #tpu.memory_space<vmem>>, vector<1x1x1xf32>
    tpu.vector_store %arg4[%c0_12, %c0_13, %c0_14], %26 {strides = array<i32>} : memref<1x1x1xf32, #tpu.memory_space<vmem>>, vector<1x1x1xf32>,
    %c0_i32_15 = arith.constant 0 : i32
    %28 = arith.cmpi eq, %arg1, %c0_i32_15 : i32
    %29 = arith.extui %28 : i1 to i32
    %c0_i32_16 = arith.constant 0 : i32
    %30 = arith.cmpi ne, %29, %c0_i32_16 : i32
    scf.if %30 {
      %c0_17 = arith.constant 0 : index
      %c0_18 = arith.constant 0 : index
      %c0_19 = arith.constant 0 : index
      %31 = vector.load %arg4[%c0_17, %c0_18, %c0_19] : memref<1x1x1xf32, #tpu.memory_space<vmem>>, vector<1x1x1xf32>
      %cst_20 = arith.constant 7.812500e-03 : f32
      %32 = vector.broadcast %cst_20 : f32 to vector<1x1x1xf32>
      %33 = arith.mulf %31, %32 : vector<1x1x1xf32>
      %c0_21 = arith.constant 0 : index
      %c0_22 = arith.constant 0 : index
      %c0_23 = arith.constant 0 : index
      %34 = vector.load %arg4[%c0_21, %c0_22, %c0_23] : memref<1x1x1xf32, #tpu.memory_space<vmem>>, vector<1x1x1xf32>
      tpu.vector_store %arg4[%c0_21, %c0_22, %c0_23], %33 {strides = array<i32>} : memref<1x1x1xf32, #tpu.memory_space<vmem>>, vector<1x1x1xf32>,
    } else {
    }
    return
  }
  func.func @transform_0(%arg0: i32, %arg1: i32) -> (i32, i32) {
    %c1_i32 = arith.constant 1 : i32
    %0 = arith.muli %arg0, %c1_i32 : i32
    %1 = arith.addi %0, %arg1 : i32
    %c0_i32 = arith.constant 0 : i32
    %c0_i32_0 = arith.constant 0 : i32
    return %1, %c0_i32 : i32, i32
  }
  func.func @transform_1(%arg0: i32, %arg1: i32) -> (i32, i32) {
    %c1_i32 = arith.constant 1 : i32
    %0 = arith.muli %arg0, %c1_i32 : i32
    %1 = arith.addi %0, %arg1 : i32
    %c0_i32 = arith.constant 0 : i32
    %c0_i32_0 = arith.constant 0 : i32
    return %1, %c0_i32 : i32, i32
  }
  func.func @transform_2(%arg0: i32, %arg1: i32) -> (i32, i32, i32) {
    %c0_i32 = arith.constant 0 : i32
    %c0_i32_0 = arith.constant 0 : i32
    %c0_i32_1 = arith.constant 0 : i32
    return %arg0, %c0_i32, %c0_i32_0 : i32, i32, i32
  }
}

</mosaic_0001>

<bundles_post_ra>
// kernel: tpu_custom_call.1
= control target key start
LH: loop header
LB: loop body
LE: loop exit
PB: predicated region body
PF: predicated region fallthrough
CT: control target
= control target key end

     0   :  { %7 = vsyncpa [#allocation3], 0  ;;  %s247_s0 = inlined_call_operand.hbm [shape: f32[8,32], index: 0, kind: input, shape index: {}]   ;;  %s248_s1 = inlined_call_operand.hbm [shape: f32[8,32], index: 1, kind: input, shape index: {}]   ;;  %s249_s2 = inlined_call_operand.hbm [shape: f32[1,1,1], index: 2, kind: output, shape index: {}]  }
   0x1   :  { %8 = vsyncpa [#allocation6], 0 }
   0x2   :  { %9 = vsyncpa [#allocation4], 0  ;;  %s189_s9 = smov [#allocation2]   ;;  %s190_s11 = smov [#allocation5]  }
   0x3   :  { %s19_s10 = sshll.u32 %s189_s9, 4  ;;  %s32_s12 = sshll.u32 %s190_s11, 4  ;;  %s20_s10 = int_to_ptr.vmem [resolvable:$true] %s19_s10  ;;  %s33_s12 = int_to_ptr.vmem [resolvable:$true] %s32_s12 }
   0x4   :  { %s117_s15 = scalar_lea.hbm %s247_s0, 128 }
   0x5   :  { %p118_p0 = scmp.ne.s32.totalorder %s247_s0, %s117_s15  ;;  %p121_p1 = scmp.lt.u32.totalorder %s117_s15, %s247_s0 }
   0x7   :  { %p123_p2 = pnand %p121_p1, %p118_p0 }
   0x9   :  { %126 = shalt.err (!%p123_p2)
}
   0xa   :  { %s127_s20 = scalar_lea.vmem %s20_s10, 128  ;;  %p132_p4 = scmp.lt.s32.totalorder %s20_s10, %s20_s10 }
   0xb   :  { %p128_p3 = scmp.ne.s32.totalorder %s20_s10, %s127_s20  ;;  %p133_p5 = scmp.lt.s32.totalorder %s127_s20, %s127_s20 }
   0xd   :  { %p134_p6 = por %p133_p5, %p132_p4 }
   0xf   :  { %p135_p7 = pnand %p134_p6, %p128_p3 }
  0x11   :  { %138 = shalt.err (!%p135_p7)
}
  0x12   :  { %22 = dma.hbm_to_vmem [thread:$0]  %s247_s0, 128, %s20_s10, [#allocation3]  }
  0x13   :  { %s139_s25 = scalar_lea.hbm %s248_s1, 128 }
  0x14   :  { %p140_p8 = scmp.ne.s32.totalorder %s248_s1, %s139_s25  ;;  %p143_p9 = scmp.lt.u32.totalorder %s139_s25, %s248_s1 }
  0x16   :  { %p145_p10 = pnand %p143_p9, %p140_p8 }
  0x18   :  { %148 = shalt.err (!%p145_p10)
}
  0x19   :  { %s149_s30 = scalar_lea.vmem %s33_s12, 128  ;;  %p154_p12 = scmp.lt.s32.totalorder %s33_s12, %s33_s12 }
  0x1a   :  { %p150_p11 = scmp.ne.s32.totalorder %s33_s12, %s149_s30  ;;  %p155_p13 = scmp.lt.s32.totalorder %s149_s30, %s149_s30 }
  0x1c   :  { %p156_p0 = por %p155_p13, %p154_p12 }
  0x1e   :  { %p157_p1 = pnand %p156_p0, %p150_p11 }
  0x20   :  { %160 = shalt.err (!%p157_p1)
}
  0x21   :  { %35 = dma.hbm_to_vmem [thread:$0]  %s248_s1, 128, %s33_s12, [#allocation6]  }
  0x22   :  { %183 = dma.done.wait [#allocation3], 128  }
  0x23   :  { %184 = vsyncadd [#allocation3], 4294967168 }
  0x24   :  { %185 = dma.done.wait [#allocation6], 128  }
  0x25   :  { %186 = vsyncadd [#allocation6], 4294967168  ;;  %v50_v0 = vld [vmem:[#allocation2] sm:$0xff]  ;;  %v51_v1 = vld [vmem:[#allocation5] sm:$0xff]  ;;  %vm55_vm0 = vcmask 261120   ;;  %vm72_vm3 = vcmask 7168  }
  0x26   :  { %v52_v2 = vsub.f32 %v50_v0, %v51_v1  ;;  %vm48_vm4 = vcmask 0   ;;  %v191_v18 = vmov 0.0   ;;  %s192_s4 = smov [#allocation7]  }
  0x27   :  { %49 = vst.msk [vmem:[#allocation7] sm:$0x1] %vm48_vm4, %v191_v18  ;;  %s99_s5 = sshll.u32 %s192_s4, 4  ;;  %s100_s5 = int_to_ptr.vmem [resolvable:$true] %s99_s5 }
  0x28   :  { %v53_v3 = vadd.f32 1e-06, %v52_v2  ;;  %s161_s6 = scalar_lea.vmem %s100_s5, 16  ;;  %s165_s7 = scalar_lea.vmem %s100_s5, 32 }
  0x29   :  { %p162_p2 = scmp.ne.s32.totalorder %s100_s5, %s161_s6  ;;  %p166_p3 = scmp.lt.s32.totalorder %s100_s5, %s100_s5 }
  0x2a   :  { %v54_v4 = vmul.f32 %v53_v3, %v53_v3  ;;  %p167_p4 = scmp.lt.s32.totalorder %s165_s7, %s161_s6 }
  0x2c   :  { %v56_v5 = vsel %vm55_vm0, %v54_v4, 0.0  ;;  %p168_p5 = por %p167_p4, %p166_p3 }
  0x2d   :  { %57 = vadd.xlane.f32.xlu0 %v56_v5 }
  0x2e   :  { %v71_v26 = vld [vmem:[#allocation7] sm:$0x1]  ;;  %p169_p6 = pnand %p168_p5, %p162_p2 }
  0xba   :  { %v58_v6 = vpop.xlane.xlu0 %57 }
  0xbb   :  { %115 = vrsqrt.f32 %v58_v6  ;;  %vm61_vm1 = vcmp.eq.f32.partialorder %v58_v6, inf  ;;  %v64_v9 = vand.u32 2147483648, %v58_v6  ;;  %vm63_vm2 = vcmp.eq.f32.partialorder %v58_v6, 0.0 }
  0xc5   :  { %v116_v7 = vpop.eup %115 }
  0xc6   :  { %v60_v8 = vmul.f32 %v116_v7, %v58_v6 }
  0xc8   :  { %v62_v10 = vsel %vm61_vm1, %v58_v6, %v60_v8 }
  0xc9   :  { %v65_v11 = vsel %vm63_vm2, %v64_v9, %v62_v10 }
  0xca   :  { %v66_v12 = vsub.f32 1.0, %v65_v11 }
  0xcc   :  { %v67_v13 = vmax.f32 %v66_v12, 0.0 }
  0xce   :  { %v68_v14 = vmul.f32 %v67_v13, %v67_v13 }
  0xd0   :  { %v69_v15 = vmul.f32 7.0, %v68_v14 }
  0xd2   :  { %v70_v16 = vadd.f32 %v69_v15, %v58_v6 }
  0xd4   :  { %v73_v17 = vsel %vm72_vm3, %v70_v16, 0.0 }
  0xd5   :  { %74 = vadd.xlane.f32.xlu0 %v73_v17 }
 0x162   :  { %v75_v19 = vpop.xlane.xlu0 %74 }
 0x163   :  { %v76_v20 = vrot.slane %v75_v19, 4 }
 0x165   :  { %v77_v21 = vadd.f32 %v76_v20, %v75_v19 }
 0x167   :  { %v78_v22 = vrot.slane %v77_v21, 2 }
 0x169   :  { %v79_v23 = vadd.f32 %v78_v22, %v77_v21 }
 0x16b   :  { %v80_v24 = vrot.slane %v79_v23, 1 }
 0x16d   :  { %v81_v25 = vadd.f32 %v80_v24, %v79_v23 }
 0x16f   :  { %109 = vpush %v81_v25 }
 0x1a0   :  { %s110_s1 = spop %109 }
 0x1a1   :  { %v83_v27 = vstv %s110_s1 }
 0x1a2   :  { %v84_v28 = vadd.f32 %v83_v27, %v71_v26 }
 0x1a4   :  { %86 = vst.msk [vmem:[#allocation7] sm:$0x1] %vm48_vm4, %v84_v28 }
 0x1ab   :  { %v90_v29 = vld [vmem:[#allocation7] sm:$0x1] }
 0x1ac   :  { %v91_v30 = vmul.f32 0.0078125, %v90_v29 }
 0x1ae   :  { %92 = vst.msk [vmem:[#allocation7] sm:$0x1] %vm48_vm4, %v91_v30 }
 0x1af   :  { %172 = shalt.err (!%p169_p6)
}
 0x1b0   :  { %s173_s10 = scalar_lea.hbm %s249_s2, 16 }
 0x1b1   :  { %p174_p7 = scmp.ne.s32.totalorder %s249_s2, %s173_s10  ;;  %p177_p8 = scmp.lt.u32.totalorder %s173_s10, %s249_s2 }
 0x1b3   :  { %p179_p9 = pnand %p177_p8, %p174_p7 }
 0x1b5   :  { %182 = shalt.err (!%p179_p9)
}
 0x1b6   :  { %102 = dma.vmem_to_hbm [thread:$0]  %s100_s5, 16, %s249_s2, [#allocation4]  }
 0x1b7   :  { %187 = dma.done.wait [#allocation4], 16  }
 0x1b8   :  { %188 = vsyncadd [#allocation4], 4294967280 }
 0x1b9   :  { %106 = vsyncpa [#allocation3], 1 }
 0x1ba   :  { %107 = vsyncpa [#allocation6], 1 }
 0x1bb   :  { %108 = vsyncpa [#allocation4], 1 }

</bundles_post_ra>
